<compile_context>
chip_gen: v6e
topology: v6e:2x2x1
jax: 0.10.0
libtpu: 0.0.40
codegen_flags: <defaults>
</compile_context>

<pallas_src>
import functools

import jax
import jax.numpy as jnp
from jax.experimental import pallas as pl
from jax.experimental.pallas import tpu as pltpu


def _rope_kernel(x_ref, sin_ref, cos_ref, o_ref):
    # x_ref / o_ref: (tb, ts, F) VMEM tiles; sin_ref / cos_ref: (ts, F),
    # broadcast over the batch-tile axis.
    x = x_ref[...]
    half = x.shape[-1] // 2
    # Lane-roll by F/2 (XLU) == concat([x[..., F/2:], x[..., :F/2]]).
    # The minus sign on the first half is already folded into sin_ref.
    x_rot = pltpu.roll(x, shift=half, axis=x.ndim - 1)
    o_ref[...] = (x_rot * sin_ref[...] + x * cos_ref[...]).astype(o_ref.dtype)


def make_rope_tables(dim, feature, dtype=jnp.float32):
    """Mirror of the torch __init__: position_sin / position_cos of shape (dim, feature)."""
    assert feature % 2 == 0
    pos = jnp.arange(dim, dtype=jnp.float32)[:, None]            # (dim, 1)
    feat = jnp.arange(0, feature, 2, dtype=jnp.float32)          # (feature//2,)
    half = pos / jnp.power(10000.0, feat / float(feature))       # (dim, feature//2)
    merge = jnp.concatenate([half, half], axis=1)                # (dim, feature)
    return jnp.sin(merge).astype(dtype), jnp.cos(merge).astype(dtype)


def _largest_aligned_divisor(total, max_tile, align):
    """Largest divisor of `total` that is <= max_tile and a multiple of `align`.

    Falls back to the full extent (always a legal block shape) if none exists.
    """
    if total <= max_tile:
        return total
    for t in range(min(max_tile, total), 0, -1):
        if total % t == 0 and t % align == 0:
            return t
    return total


def _largest_divisor_leq(total, cap):
    cap = max(1, min(cap, total))
    for t in range(cap, 0, -1):
        if total % t == 0:
            return t
    return 1


@functools.partial(jax.jit, static_argnames=("block_s", "block_b"))
def rotary_position_pallas(x, position_sin, position_cos, *, block_s=1024, block_b=None):
    """x: (B, S, F). position_sin / position_cos: (S, F). Returns (B, S, F)."""
    B, S, F = x.shape
    assert F % 2 == 0
    assert position_sin.shape == (S, F) and position_cos.shape == (S, F)

    # Fold the rotate-half sign into the sin table -> no negation in the kernel.
    # Tables are kept in x.dtype (bf16 tables for bf16 activations): deliberate,
    # small precision change that halves table HBM bytes (matters most on v5e).
    half = F // 2
    sign = jnp.concatenate(
        [-jnp.ones((1, half), x.dtype), jnp.ones((1, half), x.dtype)], axis=1)
    sin_signed = position_sin.astype(x.dtype) * sign
    cos = position_cos.astype(x.dtype)

    itemsize = jnp.dtype(x.dtype).itemsize

    # ---- Tile selection --------------------------------------------------
    # Sequence tile: largest multiple-of-8 divisor of S <= block_s (sublane
    # rule); only fall back to the full S if no such divisor exists.
    ts = _largest_aligned_divisor(S, block_s, 8)

    # Batch tile: grow until the double-buffered tile footprint hits a budget
    # sized for v7x's 64 MiB physical VMEM (comfortable on v5e/v6e's 128 MiB).
    tile_budget = 40 << 20  # double-buffered footprint target

    def _footprint(tb_):
        # 2x (double buffer) * (x tile + out tile + sin tile + cos tile)
        return 2 * (2 * tb_ * ts * F + 2 * ts * F) * itemsize

    if block_b is None:
        tb = B
        while tb > 1 and _footprint(tb) > tile_budget:
            tb = _largest_divisor_leq(B, tb - 1)
    else:
        tb = _largest_divisor_leq(B, block_b)

    tile_bytes = (2 * tb * ts * F + 2 * ts * F) * itemsize
    # Explicit scoped-VMEM limit: enough for the double-buffered tiles plus
    # headroom, capped below v7x's 64 MiB physical VMEM.
    vmem_limit = int(min(56 << 20, max(32 << 20, 2 * tile_bytes + (4 << 20))))

    # Grid: sequence tiles OUTER, batch tiles INNERMOST.  The sin/cos block
    # index depends only on the sequence-tile index, so it is unchanged between
    # consecutive grid steps -> Pallas skips the table re-DMA, and tables are
    # streamed ~once total instead of once per batch step.
    grid = (S // ts, B // tb)

    cost = pl.CostEstimate(
        flops=3 * B * S * F,                                     # 2 mul + 1 add / elem
        transcendentals=0,
        bytes_accessed=(2 * B * S * F + 2 * S * F) * itemsize,   # x + out + (sin, cos once)
    )

    return pl.pallas_call(
        _rope_kernel,
        out_shape=jax.ShapeDtypeStruct((B, S, F), x.dtype),
        grid_spec=pltpu.PrefetchScalarGridSpec(
            num_scalar_prefetch=0,
            grid=grid,
            in_specs=[
                pl.BlockSpec((tb, ts, F), lambda s, b: (b, s, 0)),  # x
                pl.BlockSpec((ts, F), lambda s, b: (s, 0)),         # signed sin (b-invariant)
                pl.BlockSpec((ts, F), lambda s, b: (s, 0)),         # cos        (b-invariant)
            ],
            out_specs=pl.BlockSpec((tb, ts, F), lambda s, b: (b, s, 0)),
        ),
        compiler_params=pltpu.CompilerParams(
            dimension_semantics=("parallel", "parallel"),
            vmem_limit_bytes=vmem_limit),
        cost_estimate=cost,
    )(x, sin_signed, cos)


def rotary_position_reference(x, position_sin, position_cos):
    """Pure-JAX transcription of the torch forward."""
    F = x.shape[2]
    x_sin = jnp.concatenate([-x[:, :, F // 2:], x[:, :, :F // 2]], axis=2)
    return x_sin * position_sin.astype(x.dtype) + x * position_cos.astype(x.dtype)


if __name__ == "__main__":
    # Small but lane-dense demo shapes: feature is a multiple of 128 so every
    # store is an unmasked vst; block_s=8 / block_b=1 gives a (2, 2) grid so the
    # DMA pipeline and the table-reuse (batch-innermost) path are exercised.
    batch, seq, feature = 2, 16, 128

    key = jax.random.PRNGKey(0)
    x = jax.random.normal(key, (batch, seq, feature), dtype=jnp.float32)
    position_sin, position_cos = make_rope_tables(seq, feature, dtype=jnp.float32)

    out = rotary_position_pallas(x, position_sin, position_cos, block_s=8, block_b=1)
    out = jax.block_until_ready(out)

    ref = rotary_position_reference(x, position_sin, position_cos)
    assert out.shape == x.shape, (out.shape, x.shape)
    assert jnp.allclose(out, ref, atol=1e-5, rtol=1e-5), "mismatch vs reference"

    # Also exercise the default (large-tile, auto batch-block) path.
    out_big = jax.block_until_ready(rotary_position_pallas(x, position_sin, position_cos))
    assert jnp.allclose(out_big, ref, atol=1e-5, rtol=1e-5), "mismatch vs reference (big tile)"

    print("KERNEL_OK")
</pallas_src>

<mosaic_0001>
module attributes {stable_mosaic.version = 11 : i64} {
  func.func @_rope_kernel(%arg0: i32, %arg1: i32, %arg2: memref<1x8x128xf32, #tpu.memory_space<vmem>>, %arg3: memref<8x128xf32, #tpu.memory_space<vmem>>, %arg4: memref<8x128xf32, #tpu.memory_space<vmem>>, %arg5: memref<1x8x128xf32, #tpu.memory_space<vmem>>) attributes {dimension_semantics = [#tpu.dimension_semantics<parallel>, #tpu.dimension_semantics<parallel>], iteration_bounds = array<i64: 2, 2>, scalar_prefetch = 0 : i64, scratch_operands = 0 : i64, tpu.core_type = #tpu.core_type<tc>, window_params = [{transform_indices = @transform_0, window_bounds = array<i64: 1, 8, 128>}, {transform_indices = @transform_1, window_bounds = array<i64: 8, 128>}, {transform_indices = @transform_2, window_bounds = array<i64: 8, 128>}, {transform_indices = @transform_3, window_bounds = array<i64: 1, 8, 128>}]} {
    %c0 = arith.constant 0 : index
    %c0_0 = arith.constant 0 : index
    %c0_1 = arith.constant 0 : index
    %0 = vector.load %arg2[%c0, %c0_0, %c0_1] : memref<1x8x128xf32, #tpu.memory_space<vmem>>, vector<1x8x128xf32>
    %c64_i32 = arith.constant 64 : i32
    %1 = tpu.dynamic_rotate %0 by %c64_i32 dim 2 : vector<1x8x128xf32>, i32 -> vector<1x8x128xf32>
    %c0_2 = arith.constant 0 : index
    %c0_3 = arith.constant 0 : index
    %2 = vector.load %arg3[%c0_2, %c0_3] : memref<8x128xf32, #tpu.memory_space<vmem>>, vector<8x128xf32>
    %3 = vector.shape_cast %2 : vector<8x128xf32> to vector<1x8x128xf32>
    %4 = arith.mulf %1, %3 : vector<1x8x128xf32>
    %c0_4 = arith.constant 0 : index
    %c0_5 = arith.constant 0 : index
    %5 = vector.load %arg4[%c0_4, %c0_5] : memref<8x128xf32, #tpu.memory_space<vmem>>, vector<8x128xf32>
    %6 = vector.shape_cast %5 : vector<8x128xf32> to vector<1x8x128xf32>
    %7 = arith.mulf %0, %6 : vector<1x8x128xf32>
    %8 = arith.addf %4, %7 : vector<1x8x128xf32>
    %c0_6 = arith.constant 0 : index
    %c0_7 = arith.constant 0 : index
    %c0_8 = arith.constant 0 : index
    %9 = vector.load %arg5[%c0_6, %c0_7, %c0_8] : memref<1x8x128xf32, #tpu.memory_space<vmem>>, vector<1x8x128xf32>
    tpu.vector_store %arg5[%c0_6, %c0_7, %c0_8], %8 {strides = array<i32>} : memref<1x8x128xf32, #tpu.memory_space<vmem>>, vector<1x8x128xf32>,
    return
  }
  func.func @transform_0(%arg0: i32, %arg1: i32) -> (i32, i32, i32) {
    %c0_i32 = arith.constant 0 : i32
    %c0_i32_0 = arith.constant 0 : i32
    return %arg1, %arg0, %c0_i32 : i32, i32, i32
  }
  func.func @transform_1(%arg0: i32, %arg1: i32) -> (i32, i32) {
    %c0_i32 = arith.constant 0 : i32
    %c0_i32_0 = arith.constant 0 : i32
    return %arg0, %c0_i32 : i32, i32
  }
  func.func @transform_2(%arg0: i32, %arg1: i32) -> (i32, i32) {
    %c0_i32 = arith.constant 0 : i32
    %c0_i32_0 = arith.constant 0 : i32
    return %arg0, %c0_i32 : i32, i32
  }
  func.func @transform_3(%arg0: i32, %arg1: i32) -> (i32, i32, i32) {
    %c0_i32 = arith.constant 0 : i32
    %c0_i32_0 = arith.constant 0 : i32
    return %arg1, %arg0, %c0_i32 : i32, i32, i32
  }
}

</mosaic_0001>

<bundles_post_ra>
// kernel: rotary_position_pallas.1
= control target key start
LH: loop header
LB: loop body
LE: loop exit
PB: predicated region body
PF: predicated region fallthrough
CT: control target
= control target key end

     0   :  { %s869_s0 = inlined_call_operand.vmem [shape: f32[2,16,128], index: 0, kind: input, shape index: {}]   ;;  %s870_s1 = inlined_call_operand.vmem [shape: f32[16,128], index: 1, kind: input, shape index: {}]   ;;  %s871_s2 = inlined_call_operand.hbm [shape: f32[16,128], index: 2, kind: input, shape index: {}]   ;;  %s872_s3 = inlined_call_operand.hbm [shape: f32[2,16,128], index: 3, kind: output, shape index: {}]  }
   0x1   :  { %877 = sst [smem:[#allocation13_spill]] %s871_s2 }
   0x2   :  { %8 = vsyncpa [#allocation3], 0 }
   0x3   :  { %10 = vsyncpa [#allocation3 + $0x1], 0 }
   0x4   :  { %11 = vsyncpa [#allocation4], 0 }
   0x5   :  { %13 = vsyncpa [#allocation4 + $0x1], 0  ;;  %s679_s12 = smov 0   ;;  %s681_s13 = smov 0  }
   0x6   :  { %s683_s14 = smov 0   ;;  %s685_s15 = smov 0  }
   0x7   :  { %s687_s16 = smov 0   ;;  %s689_s17 = smov 0  }
   0x8   :  { %s691_s18 = smov 0   ;;  %s693_s19 = smov 0  }
   0x9   :  { %s695_s20 = smov 0   ;;  %s697_s21 = smov 0  }
   0xa   :  { %s699_s22 = smov 0  }
   0xb LB: > { %878 = sst [smem:[#allocation8_spill]] %s646_s20  ;;  %s386_s23 = sadd.s32 4294967295, %s654_s22   ;;  %s654_s22 = sphi %s699_s22, %s19_s22   ;;  %s650_s21 = sphi %s697_s21, %s894_s21   ;;  %s646_s20 = sphi %s695_s20, %s893_s20   ;;  %s642_s19 = sphi %s693_s19, %s892_s19   ;;  %s638_s18 = sphi %s691_s18, %s891_s18   ;;  %s634_s17 = sphi %s689_s17, %s900_s17   ;;  %s630_s16 = sphi %s687_s16, %s899_s16   ;;  %s626_s15 = sphi %s685_s15, %s898_s15   ;;  %s622_s14 = sphi %s683_s14, %s897_s14   ;;  %s618_s13 = sphi %s681_s13, %s896_s13   ;;  %s614_s12 = sphi %s679_s12, %s895_s12  }
   0xc   : > { %879 = sst [smem:[#allocation9_spill]] %s650_s21  ;;  %s387_s24 = sadd.s32 4294967294, %s654_s22  }
   0xd   : > { %s28_s25 = sadd.s32 1, %s646_s20  ;;  %s31_s26 = sadd.s32 1, %s650_s21 }
   0xe   : > { %p29_p0 = scmp.ge.s32.totalorder %s28_s25, 2  ;;  %s92_s27 = sadd.s32 1, %s634_s17 }
   0xf   : > { %p99_p1 = scmp.ne.s32.totalorder %s634_s17, %s630_s16  ;;  %p100_p2 = scmp.eq.s32.totalorder %s654_s22, 0 }
  0x10   : > { %s902_s25 = smov (%p29_p0, %s28_s25), 0  ;;  %s904_s26 = smov (!%p29_p0, %s31_s26), %s650_s21 }
  0x11   : > { %880 = sst [smem:[#allocation10_spill]] %s902_s25  ;;  %p743_p3 = por %p100_p2, %p99_p1 }
  0x12   : > { %p105_p4 = scmp.ne.s32.totalorder %s630_s16, %s626_s15  ;;  %p33_p5 = scmp.ge.s32.totalorder %s904_s26, 2 }
  0x13   : > { %p106_p6 = scmp.eq.s32.totalorder %s386_s23, 0  ;;  %s115_s29 = ssub.s32 %s646_s20, %s902_s25 }
  0x14   : > { %s120_s30 = sadd.s32 1, %s622_s14  ;;  %s906_s26 = smov (%p33_p5, %s904_s26), 0 }
  0x15   : > { %882 = sst [smem:[#allocation11_spill]] %s906_s26  ;;  %p753_p7 = por %p106_p6, %p105_p4 }
  0x16   : > { %p130_p8 = scmp.ne.s32.totalorder %s622_s14, %s618_s13  ;;  %s89_s5 = ssub.s32 %s650_s21, %s906_s26 }
  0x17   : > { %p131_p9 = scmp.eq.s32.totalorder %s386_s23, 3  ;;  %p90_p10 = scmp.eq.s32.totalorder %s89_s5, 0 }
  0x18   : > { %s117_s6 = sor.u32 %s115_s29, %s89_s5  ;;  %p136_p13 = scmp.ne.s32.totalorder %s618_s13, %s614_s12 }
  0x19   : > { %p118_p11 = scmp.eq.s32.totalorder %s117_s6, 0  ;;  %p761_p12 = por %p131_p9, %p130_p8 }
  0x1a   : > { %s766_s8 = scalar_select %p90_p10, %s634_s17, %s92_s27  }
  0x1b   : > { %s769_s9 = scalar_select %p118_p11, %s622_s14, %s120_s30  }
  0x1c   : > { %885 = sst [smem:[#allocation12_spill]] %s766_s8  ;;  %p137_p0 = scmp.eq.s32.totalorder %s387_s24, 3 }
  0x1d   : > { %p415_p1 = scmp.lt.s32.totalorder %s654_s22, 4  ;;  %s175_s11 = sand.u32 1, %s634_s17  }
  0x1e   : > { %p774_p2 = por %p137_p0, %p136_p13  ;;  %s390_s15 = sshll.u32 %s175_s11, 3 }
  0x1f   : > { %s391_s23 = sshll.u32 %s650_s21, 7  ;;  %s887_s2 = sld [smem:[#allocation13_spill]] }
  0x20   : > { %s886_s10 = scalar_select %p774_p2, 1, 0 }
  0x21   : > { %s179_s26 = scalar_lea.vmem [#allocation2], %s390_s15  ;;  %p785_p4 = pnand %p415_p1, %p743_p3 }
  0x22   : > { %s186_s25 = sshll.u32 %s179_s26, 4  ;;  %p392_p5 = scmp.ge.s32.totalorder %s654_s22, 1  ;;  %s187_s25 = int_to_ptr.vmem [resolvable:$true] %s186_s25 }
  0x23   : > { %p191_p6 = scmp.lt.s32.totalorder %s654_s22, 5  ;;  %s176_s24 = scalar_lea.sflag [#allocation3], %s175_s11 }
  0x24   : > { %p508_p8 = pneg %p785_p4  ;;  %s519_s30 = scalar_lea.vmem %s187_s25, 128 }
  0x25   : > { %s184_s6 = scalar_lea.hbm %s887_s2, %s391_s23  ;;  %p520_p9 = scmp.ne.s32.totalorder %s187_s25, %s519_s30 }
  0x26   : > { %s656_s29 = smov [#allocation2]  }
  0x27   : > { %p522_p10 = pnand %p520_p9, %p508_p8  ;;  %s524_s23 = sshll.u32 %s656_s29, 4  ;;  %s525_s23 = int_to_ptr.vmem [resolvable:$false] %s524_s23 }
  0x28   : > { %s526_s26 = scalar_lea.vmem %s525_s23, 256  ;;  %p527_p13 = scmp.lt.s32.totalorder %s187_s25, %s525_s23 }
  0x29   : > { %p523_p11 = pneg %p522_p10  ;;  %p528_p0 = scmp.lt.s32.totalorder %s526_s26, %s519_s30 }
  0x2b   : > { %p529_p3 = por %p528_p0, %p527_p13 }
  0x2d   : > { %p530_p1 = pnand %p529_p3, %p523_p11 }
  0x2f   : > { %533 = shalt.err (!%p530_p1)
}
  0x30   : > { %410 = dma.hbm_to_vmem [thread:$0]  (!%p785_p4), %s184_s6, 128, %s187_s25, %s176_s24  }
  0x31   : > { %p192_p2 = pnand %p392_p5, %p191_p6 }
  0x32   : > { %s197_s28 = sand.u32 (!%p192_p2), 1, %s630_s16  }
  0x33   : > { %195 = sbr.rel (%p192_p2) target bundleno = 198 (0xc6), region = 32  ;;  %s393_s11 = sshll.u32 (!%p192_p2), %s197_s28, 3 }
  0x34   : > { %s198_s15 = scalar_lea.sflag (!%p192_p2), [#allocation3], %s197_s28  ;;  %s201_s5 = scalar_lea.vmem (!%p192_p2), [#allocation2], %s393_s11 }
  0x38   : > { %605 = dma.done.wait (%p753_p7), %s198_s15, 128  }
  0x39   : > { %607 = vsyncadd (%p753_p7), %s198_s15, 4294967168  ;;  %p236_p4 = scmp.lt.s32.totalorder %s638_s18, 1  ;;  %p238_p5 = scmp.lt.s32.totalorder %s642_s19, 1  ;;  %v253_v1 = vld [vmem:[%s201_s5] sm:$0xff] }
  0x3a   : > { %s657_s4 = smov 64   ;;  %s233_s28 = sand.u32 1, %s618_s13  }
  0x3b   : > { %s237_s25 = scalar_select %p236_p4, %s638_s18, 1 }
  0x3c   : > { %s239_s6 = scalar_select %p238_p5, %s642_s19, 1 }
  0x3d   : > { %s395_s27 = sshll.u32 %s237_s25, 1  ;;  %s394_s15 = sshll.u32 %s233_s28, 3 }
  0x3e   : > { %s241_s24 = sadd.s32 %s395_s27, %s239_s6  ;;  %s397_s11 = sshll.u32 %s239_s6, 3 }
  0x3f   : > { %s396_s30 = sshll.u32 %s241_s24, 3  ;;  %s399_s2 = sshll.u32 %s638_s18, 1 }
  0x40   : > { %s243_s26 = scalar_lea.vmem %s869_s0, %s396_s30  ;;  %s247_s8 = scalar_lea.vmem %s870_s1, %s397_s11 }
  0x41   : > { %v248_v0 = vld [vmem:[%s243_s26] sm:$0xff]  ;;  %s269_s25 = sadd.s32 %s642_s19, %s399_s2  ;;  %s235_s24 = scalar_lea.vmem [#allocation5], %s394_s15 }
  0x42   : > { %249 = vrot.lane.b32.xlu0 %v248_v0, %s657_s4  ;;  %v251_v2 = vld [vmem:[%s247_s8] sm:$0xff]  ;;  %v254_v3 = vmul.f32 %v253_v1, %v248_v0  ;;  %s400_s27 = sshll.u32 %s269_s25, 7  ;;  %s273_s30 = sshll.u32 %s235_s24, 4  ;;  %s274_s30 = int_to_ptr.vmem [resolvable:$true] %s273_s30 }
  0x43   : > { %s271_s6 = scalar_lea.hbm %s872_s3, %s400_s27  ;;  %s258_s18 = scalar_lea.sflag [#allocation4], %s233_s28 }
  0x44   : > { %s534_s20 = scalar_lea.vmem %s274_s30, 128  ;;  %s658_s2 = smov [#allocation5]  }
  0x45   : > { %p535_p7 = scmp.ne.s32.totalorder %s274_s30, %s534_s20  ;;  %s538_s19 = sshll.u32 %s658_s2, 4  ;;  %s539_s19 = int_to_ptr.vmem [resolvable:$false] %s538_s19 }
  0x46   : > { %s540_s21 = scalar_lea.vmem %s539_s19, 256  ;;  %p541_p8 = scmp.lt.s32.totalorder %s274_s30, %s539_s19 }
  0x47   : > { %p536_p2 = pnand %p535_p7, %p761_p12  ;;  %p542_p9 = scmp.lt.s32.totalorder %s540_s21, %s534_s20 }
  0x49   : > { %p537_p6 = pneg %p536_p2  ;;  %p543_p10 = por %p542_p9, %p541_p8 }
  0x4b   : > { %p544_p11 = pnand %p543_p10, %p537_p6 }
  0xb4   : > { %v250_v4 = vpop.permute.xlu0 %249 }
  0xb5   : > { %v252_v5 = vmul.f32 %v251_v2, %v250_v4 }
  0xb7   : > { %v255_v6 = vadd.f32 %v254_v3, %v252_v5 }
  0xb9   : > { %256 = vst [vmem:[%s235_s24] sm:$0xff] %v255_v6 }
  0xba   : > { %547 = shalt.err (!%p544_p11)
}
  0xbb   : > { %s548_s8 = scalar_lea.hbm %s271_s6, 128  ;;  %s552_s4 = scalar_lea.hbm %s872_s3, 512 }
  0xbc   : > { %p549_p13 = scmp.ne.s32.totalorder %s271_s6, %s548_s8  ;;  %p553_p1 = scmp.lt.s32.totalorder %s271_s6, %s872_s3 }
  0xbd   : > { %p554_p4 = scmp.lt.s32.totalorder %s552_s4, %s548_s8 }
  0xbe   : > { %p550_p0 = pnand %p549_p13, %p761_p12 }
  0xbf   : > { %p555_p5 = por %p554_p4, %p553_p1 }
  0xc0   : > { %p551_p3 = pneg %p550_p0 }
  0xc2   : > { %p556_p7 = pnand %p555_p5, %p551_p3 }
  0xc4   : > { %559 = shalt.err (!%p556_p7)
}
  0xc5   : > { %405 = dma.vmem_to_hbm [thread:$0]  (%p761_p12), %s274_s30, 128, %s271_s6, %s258_s18  }
  0xc6 PF: > { %p416_p2 = scmp.ge.s32.totalorder %s654_s22, 2  ;;  %s285_s15 = sand.u32 1, %s614_s12  }
  0xc7   : > { %p889_p6 = scmp.ne.s32.totalorder %s886_s10, 0  ;;  %s286_s25 = scalar_lea.sflag [#allocation4], %s285_s15 }
  0xc9   : > { %p412_p8 = pnand %p416_p2, %p889_p6 }
  0xcb   : > { %p413_p9 = pneg %p412_p8 }
  0xcd   : > { %609 = dma.done.wait (%p413_p9), %s286_s25, 128  }
  0xce   : > { %611 = vsyncadd (%p413_p9), %s286_s25, 4294967168  ;;  %s19_s22 = sadd.s32 1, %s654_s22   ;;  %s890_s7 = sld [smem:[#allocation12_spill]] }
  0xcf   : > { %p16_p10 = scmp.ge.s32.totalorder %s19_s22, 6   ;;  %s891_s18 = sld [smem:[#allocation8_spill]] }
  0xd0   : > { %s892_s19 = sld [smem:[#allocation9_spill]]  ;;  %s895_s12 = smov %s618_s13 }
  0xd1   : > { %s893_s20 = sld [smem:[#allocation10_spill]]  ;;  %s896_s13 = smov %s622_s14 }
  0xd2   : > { %s894_s21 = sld [smem:[#allocation11_spill]]  ;;  %s897_s14 = smov %s769_s9 }
  0xd3   : > { %s898_s15 = smov %s630_s16  ;;  %s899_s16 = smov %s634_s17 }
  0xd4   : > { %s900_s17 = smov %s890_s7  ;;  %18 = sbr.rel (!%p16_p10) target bundleno = 11 (0xb), region = 83 }
  0xd9   :  { %291 = vsyncpa [#allocation3], 1 }
  0xda   :  { %293 = vsyncpa [#allocation3 + $0x1], 1 }
  0xdb   :  { %294 = vsyncpa [#allocation4], 1 }
  0xdc   :  { %296 = vsyncpa [#allocation4 + $0x1], 1 }

</bundles_post_ra>
